<compile_context>
chip_gen: v6e
topology: v6e:2x2x1
jax: 0.10.0
libtpu: 0.0.40
codegen_flags: <defaults>
</compile_context>

<pallas_src>
import functools

import jax
import jax.numpy as jnp
from jax import lax
from jax.experimental import pallas as pl
from jax.experimental.pallas import tpu as pltpu

LANE = 128
SUBLANE = 8

TARGET_TILE_BYTES = 8 * 1024 * 1024    # ~8 MiB per streamed grid step
VMEM_LIMIT = 48 * 1024 * 1024          # safe on v7x (64 MiB phys) and v5e/v6e (128 MiB)
FUSED_MAX_BYTES = 8 * 1024 * 1024      # slabs up to this size take the fused 1-pass path


def _round_up(x, m):
    return ((x + m - 1) // m) * m


def _sublane_align(dtype):
    return {4: 8, 2: 16, 1: 32}.get(jnp.dtype(dtype).itemsize, 8)


def _choose_tile_r(R, dtype, tile_bytes=TARGET_TILE_BYTES):
    align = _sublane_align(dtype)
    itemsize = jnp.dtype(dtype).itemsize
    target = max(align, (tile_bytes // (LANE * itemsize)) // align * align)
    return min(R, target)


# ---------------------------------------------------------------------------
# Kernel 1 (two-pass path): global min / max reduction.
# Grid = (steps,).  Resident (8,128) f32 partial min / max outputs, updated with
# pure elementwise VPU min/max per step.  Rows beyond the logical extent (ragged
# last block) are masked with +/-inf.  Final tiny reduce happens in the wrapper.
# ---------------------------------------------------------------------------
def _minmax_kernel(x_ref, min_ref, max_ref, *, valid_rows):
    s = pl.program_id(0)

    @pl.when(s == 0)
    def _():
        min_ref[...] = jnp.full((SUBLANE, LANE), jnp.inf, jnp.float32)
        max_ref[...] = jnp.full((SUBLANE, LANE), -jnp.inf, jnp.float32)

    tile_r = x_ref.shape[0]
    x = x_ref[...].astype(jnp.float32)
    start_row = s * tile_r
    end_row = start_row + tile_r

    def _fold(x_for_min, x_for_max):
        # (tile_r,128) -> (8,128): reduce over the leading vreg-group axis is a
        # chain of elementwise mins/maxes across vregs (VPU only, no XLU).
        pmin = jnp.min(x_for_min.reshape(-1, SUBLANE, LANE), axis=0)
        pmax = jnp.max(x_for_max.reshape(-1, SUBLANE, LANE), axis=0)
        min_ref[...] = jnp.minimum(min_ref[...], pmin)
        max_ref[...] = jnp.maximum(max_ref[...], pmax)

    @pl.when(end_row <= valid_rows)      # fully in-bounds block (common case)
    def _():
        _fold(x, x)

    @pl.when(end_row > valid_rows)       # ragged last block: mask invalid rows
    def _():
        row = start_row + lax.broadcasted_iota(jnp.int32, x.shape, 0)
        valid = row < valid_rows
        _fold(jnp.where(valid, x, jnp.inf), jnp.where(valid, x, -jnp.inf))


def pallas_minmax(x2d, tile_r):
    R = x2d.shape[0]
    steps = pl.cdiv(R, tile_r)
    mins, maxs = pl.pallas_call(
        functools.partial(_minmax_kernel, valid_rows=R),
        out_shape=(
            jax.ShapeDtypeStruct((SUBLANE, LANE), jnp.float32),
            jax.ShapeDtypeStruct((SUBLANE, LANE), jnp.float32),
        ),
        grid=(steps,),
        in_specs=[pl.BlockSpec((tile_r, LANE), lambda s: (s, 0))],
        out_specs=(
            pl.BlockSpec((SUBLANE, LANE), lambda s: (0, 0)),
            pl.BlockSpec((SUBLANE, LANE), lambda s: (0, 0)),
        ),
        compiler_params=pltpu.CompilerParams(
            dimension_semantics=("arbitrary",),
            vmem_limit_bytes=VMEM_LIMIT,
        ),
    )(x2d)
    # Tiny (8,128) final reduce in the wrapper (negligible).
    return jnp.min(mins), jnp.max(maxs)


# ---------------------------------------------------------------------------
# Kernel 2 (two-pass path): asymmetric fake-quantization.
#   q   = clamp(round(scale * x - zero_point), -2^(k-1), 2^(k-1)-1)
#   out = (q + zero_point) * inv_scale
# scale / zero_point / inv_scale are scalars in SMEM; math in f32 in-register.
# ---------------------------------------------------------------------------
def _quant_kernel(params_ref, x_ref, o_ref, *, n):
    scale = params_ref[0]
    zp = params_ref[1]
    inv_scale = params_ref[2]
    x = x_ref[...].astype(jnp.float32)
    q = jnp.clip(jnp.round(scale * x - zp), -float(n), float(n - 1))
    o_ref[...] = ((q + zp) * inv_scale).astype(o_ref.dtype)


def pallas_quantize(x2d, scale, zero_point, inv_scale, activation_bit, tile_r,
                    donate_slab=False):
    R = x2d.shape[0]
    n = 2 ** (activation_bit - 1)
    params = jnp.stack([scale, zero_point, inv_scale]).astype(jnp.float32)
    return pl.pallas_call(
        functools.partial(_quant_kernel, n=n),
        out_shape=jax.ShapeDtypeStruct(x2d.shape, x2d.dtype),
        grid=(pl.cdiv(R, tile_r),),
        in_specs=[
            pl.BlockSpec(memory_space=pltpu.MemorySpace.SMEM),
            pl.BlockSpec((tile_r, LANE), lambda i: (i, 0)),
        ],
        out_specs=pl.BlockSpec((tile_r, LANE), lambda i: (i, 0)),
        # Optional: alias the slab to the output to avoid a second full-size
        # HBM allocation when the caller can donate x.
        input_output_aliases=({1: 0} if donate_slab else {}),
        compiler_params=pltpu.CompilerParams(
            dimension_semantics=("parallel",),
            vmem_limit_bytes=VMEM_LIMIT,
        ),
    )(params, x2d)


# ---------------------------------------------------------------------------
# Kernel 3 (fused path, slab <= FUSED_MAX_BYTES): single launch.
# Reads the whole slab once from HBM, folds min/max, does the EMA + quant-param
# math in-kernel from SMEM state scalars, fake-quantizes and writes.  The new
# EMA min/max are returned as (8,128) splat outputs (wrapper reads [0,0]).
# ---------------------------------------------------------------------------
def _fused_kernel(params_ref, x_ref, o_ref, min_ref, max_ref, *, k):
    # params: [x_min_old, x_max_old, beta, beta_t_new]
    x = x_ref[...].astype(jnp.float32)
    bmin = jnp.min(x)
    bmax = jnp.max(x)

    beta = params_ref[2]
    beta_t = params_ref[3]
    x_min = (params_ref[0] * beta + bmin * (1.0 - beta)) / (1.0 - beta_t)
    x_max = (params_ref[1] * beta + bmax * (1.0 - beta)) / (1.0 - beta_t)
    min_ref[...] = jnp.broadcast_to(x_min, (SUBLANE, LANE)).astype(jnp.float32)
    max_ref[...] = jnp.broadcast_to(x_max, (SUBLANE, LANE)).astype(jnp.float32)

    n_levels = float(2 ** k - 1)
    n = float(2 ** (k - 1))
    scale = n_levels / jnp.maximum(x_max - x_min, 1e-8)
    zp = jnp.round(scale * x_min) + n
    inv_scale = 1.0 / scale
    q = jnp.clip(jnp.round(scale * x - zp), -n, n - 1.0)
    o_ref[...] = ((q + zp) * inv_scale).astype(o_ref.dtype)


def pallas_fused_quant(x2d, x_min_old, x_max_old, beta, beta_t_new, activation_bit):
    params = jnp.stack([x_min_old, x_max_old, beta, beta_t_new]).astype(jnp.float32)
    out2d, mins, maxs = pl.pallas_call(
        functools.partial(_fused_kernel, k=activation_bit),
        out_shape=(
            jax.ShapeDtypeStruct(x2d.shape, x2d.dtype),
            jax.ShapeDtypeStruct((SUBLANE, LANE), jnp.float32),
            jax.ShapeDtypeStruct((SUBLANE, LANE), jnp.float32),
        ),
        in_specs=[
            pl.BlockSpec(memory_space=pltpu.MemorySpace.SMEM),
            pl.BlockSpec(memory_space=pltpu.MemorySpace.VMEM),
        ],
        out_specs=(
            pl.BlockSpec(memory_space=pltpu.MemorySpace.VMEM),
            pl.BlockSpec(memory_space=pltpu.MemorySpace.VMEM),
            pl.BlockSpec(memory_space=pltpu.MemorySpace.VMEM),
        ),
        compiler_params=pltpu.CompilerParams(vmem_limit_bytes=VMEM_LIMIT),
    )(params, x2d)
    return out2d, mins[0, 0], maxs[0, 0]


# ---------------------------------------------------------------------------
# Glue: flatten to an (R, 128) slab, parameter setup, EMA scalar math, dispatch.
# ---------------------------------------------------------------------------
def _to_slab(x):
    flat = x.reshape(-1)
    total = flat.shape[0]
    align_elems = _sublane_align(x.dtype) * LANE
    padded = _round_up(total, align_elems)
    was_padded = padded != total
    if was_padded:
        # Pad with an existing element so the global min/max is unaffected.
        # TODO(synk): for large unaligned tensors this pad + tail slice costs two
        # extra full-tensor copies; an element-masked ragged path would avoid it.
        # Typical (aligned) activation shapes skip this entirely.
        flat = jnp.concatenate(
            [flat, jnp.full((padded - total,), flat[0], dtype=flat.dtype)]
        )
    return flat.reshape(padded // LANE, LANE), total, was_padded


def init_quant_act_state(beta=0.9):
    """Deterministic init matching QuantAct.__init__ buffers."""
    return dict(
        x_min=jnp.zeros((), jnp.float32),
        x_max=jnp.zeros((), jnp.float32),
        beta=jnp.array(beta, jnp.float32),
        beta_t=jnp.ones((), jnp.float32),
    )


def quant_act_forward(
    x,
    state,
    activation_bit=8,
    full_precision_flag=False,
    running_stat=True,
    fused_max_bytes=FUSED_MAX_BYTES,
    tile_bytes=TARGET_TILE_BYTES,
):
    """Functional equivalent of QuantAct.forward. Returns (output, new_state)."""
    x2d, total, was_padded = _to_slab(x)
    slab_bytes = x2d.size * jnp.dtype(x2d.dtype).itemsize

    new_state = dict(state)
    beta = state["beta"]
    k = activation_bit

    def _two_pass_stats():
        tile_r = _choose_tile_r(x2d.shape[0], x2d.dtype, tile_bytes)
        bmin, bmax = pallas_minmax(x2d, tile_r)
        beta_t = state["beta_t"] * beta
        x_min = (state["x_min"] * beta + bmin * (1.0 - beta)) / (1.0 - beta_t)
        x_max = (state["x_max"] * beta + bmax * (1.0 - beta)) / (1.0 - beta_t)
        return dict(x_min=x_min, x_max=x_max, beta=beta, beta_t=beta_t)

    if full_precision_flag:
        if running_stat:
            new_state = _two_pass_stats()
        return x, new_state

    if running_stat and slab_bytes <= fused_max_bytes:
        # Fused single pass: min/max fold + EMA + fake-quant in one launch.
        beta_t = state["beta_t"] * beta
        out2d, x_min, x_max = pallas_fused_quant(
            x2d, state["x_min"], state["x_max"], beta, beta_t, k
        )
        new_state = dict(x_min=x_min, x_max=x_max, beta=beta, beta_t=beta_t)
    else:
        if running_stat:
            new_state = _two_pass_stats()
        n_levels = float(2 ** k - 1)
        sat = jnp.maximum(new_state["x_max"] - new_state["x_min"], 1e-8)
        scale = n_levels / sat
        zero_point = jnp.round(scale * new_state["x_min"]) + float(2 ** (k - 1))
        inv_scale = 1.0 / scale  # hoisted: kernel multiplies instead of dividing
        tile_r = _choose_tile_r(x2d.shape[0], x2d.dtype, tile_bytes)
        out2d = pallas_quantize(x2d, scale, zero_point, inv_scale, k, tile_r)

    if was_padded:
        out = out2d.reshape(-1)[:total].reshape(x.shape)
    else:
        out = out2d.reshape(x.shape)
    return out, new_state


# ---------------------------------------------------------------------------
# Pure-JAX reference for validation.
# ---------------------------------------------------------------------------
def _reference_forward(x, state, activation_bit=8, running_stat=True):
    xf = x.astype(jnp.float32)
    if running_stat:
        x_min_b, x_max_b = jnp.min(xf), jnp.max(xf)
        beta = state["beta"]
        beta_t = state["beta_t"] * beta
        x_min = (state["x_min"] * beta + x_min_b * (1.0 - beta)) / (1.0 - beta_t)
        x_max = (state["x_max"] * beta + x_max_b * (1.0 - beta)) / (1.0 - beta_t)
    else:
        x_min, x_max = state["x_min"], state["x_max"]
    k = activation_bit
    n_levels = float(2 ** k - 1)
    scale = n_levels / jnp.maximum(x_max - x_min, 1e-8)
    zp = jnp.round(scale * x_min) + float(2 ** (k - 1))
    q = jnp.clip(jnp.round(scale * xf - zp), -(2 ** (k - 1)), 2 ** (k - 1) - 1)
    return ((q + zp) / scale).astype(x.dtype), x_min, x_max


if __name__ == "__main__":
    key = jax.random.PRNGKey(0)
    state = init_quant_act_state(beta=0.9)

    # 1) Small NCHW activation (aligned, fused single-pass path).
    x = jax.random.normal(key, (2, 4, 16, 16), dtype=jnp.float32)
    out, st1 = quant_act_forward(
        x, state, activation_bit=8, full_precision_flag=False, running_stat=True
    )
    out = jax.block_until_ready(out)
    ref_out, ref_min, ref_max = _reference_forward(x, state, activation_bit=8)
    assert out.shape == x.shape and out.dtype == x.dtype
    assert jnp.allclose(out, ref_out, atol=1e-5, rtol=1e-5)
    assert jnp.allclose(st1["x_min"], ref_min, atol=1e-6)
    assert jnp.allclose(st1["x_max"], ref_max, atol=1e-6)

    # 2) Non-aligned element count (exercises minimal-pad + tail-slice path).
    x2 = jax.random.normal(jax.random.PRNGKey(1), (3, 5, 7, 11), dtype=jnp.float32)
    out2, st2 = quant_act_forward(x2, state, activation_bit=8)
    out2 = jax.block_until_ready(out2)
    ref2, ref2_min, ref2_max = _reference_forward(x2, state, activation_bit=8)
    assert jnp.allclose(out2, ref2, atol=1e-5, rtol=1e-5)
    assert jnp.allclose(st2["x_min"], ref2_min, atol=1e-6)
    assert jnp.allclose(st2["x_max"], ref2_max, atol=1e-6)

    # 3a) Medium tensor, fused path (default dispatch).
    x3 = jax.random.normal(jax.random.PRNGKey(2), (8, 32, 56, 56), dtype=jnp.float32)
    ref3, ref3_min, ref3_max = _reference_forward(x3, state, activation_bit=8)
    out3, st3 = quant_act_forward(x3, state, activation_bit=8)
    out3 = jax.block_until_ready(out3)
    assert jnp.allclose(out3, ref3, atol=1e-5, rtol=1e-5)
    assert jnp.allclose(st3["x_min"], ref3_min, atol=1e-6)
    assert jnp.allclose(st3["x_max"], ref3_max, atol=1e-6)

    # 3b) Same tensor forced through the two-pass streaming path with a small tile
    #     (multi-block grid + ragged last block masking in both kernels).
    out3b, st3b = quant_act_forward(
        x3, state, activation_bit=8, fused_max_bytes=0, tile_bytes=1 * 1024 * 1024
    )
    out3b = jax.block_until_ready(out3b)
    assert jnp.allclose(out3b, ref3, atol=1e-5, rtol=1e-5)
    assert jnp.allclose(st3b["x_min"], ref3_min, atol=1e-6)
    assert jnp.allclose(st3b["x_max"], ref3_max, atol=1e-6)

    # 4) Frozen stats (running_stat=False): quantize-only path with stored range.
    x4 = jax.random.normal(jax.random.PRNGKey(3), (2, 4, 16, 16), dtype=jnp.float32)
    out4, st4 = quant_act_forward(x4, st1, activation_bit=8, running_stat=False)
    out4 = jax.block_until_ready(out4)
    ref4, _, _ = _reference_forward(x4, st1, activation_bit=8, running_stat=False)
    assert jnp.allclose(out4, ref4, atol=1e-5, rtol=1e-5)
    assert jnp.allclose(st4["x_min"], st1["x_min"])

    # 5) full_precision_flag=True: stats still update, output passes through.
    out5, st5 = quant_act_forward(x, state, activation_bit=8, full_precision_flag=True)
    out5 = jax.block_until_ready(out5)
    assert jnp.array_equal(out5, x)
    assert jnp.allclose(st5["x_min"], ref_min, atol=1e-6)
    assert jnp.allclose(st5["x_max"], ref_max, atol=1e-6)

    print("KERNEL_OK")
</pallas_src>

<mosaic_0001>
module attributes {stable_mosaic.version = 11 : i64} {
  func.func @_fused_kernel(%arg0: memref<4xf32, #tpu.memory_space<smem>>, %arg1: memref<16x128xf32, #tpu.memory_space<vmem>>, %arg2: memref<16x128xf32, #tpu.memory_space<vmem>>, %arg3: memref<8x128xf32, #tpu.memory_space<vmem>>, %arg4: memref<8x128xf32, #tpu.memory_space<vmem>>) attributes {dimension_semantics = [], scalar_prefetch = 0 : i64, scratch_operands = 0 : i64, tpu.core_type = #tpu.core_type<tc>} {
    %c0 = arith.constant 0 : index
    %c0_0 = arith.constant 0 : index
    %0 = vector.load %arg1[%c0, %c0_0] : memref<16x128xf32, #tpu.memory_space<vmem>>, vector<16x128xf32>
    %1 = vector.shape_cast %0 : vector<16x128xf32> to vector<1x16x128xf32>
    %cst = arith.constant dense<0x7F800000> : vector<1xf32>
    %2 = vector.multi_reduction <minimumf>, %1, %cst [1, 2] : vector<1x16x128xf32> to vector<1xf32>
    %3 = vector.shape_cast %2 : vector<1xf32> to vector<1x1x1xf32>
    %4 = vector.extract %3[0, 0, 0] : f32 from vector<1x1x1xf32>
    %5 = vector.shape_cast %0 : vector<16x128xf32> to vector<1x16x128xf32>
    %cst_1 = arith.constant dense<0xFF800000> : vector<1xf32>
    %6 = vector.multi_reduction <maximumf>, %5, %cst_1 [1, 2] : vector<1x16x128xf32> to vector<1xf32>
    %7 = vector.shape_cast %6 : vector<1xf32> to vector<1x1x1xf32>
    %8 = vector.extract %7[0, 0, 0] : f32 from vector<1x1x1xf32>
    %c2 = arith.constant 2 : index
    %9 = memref.load %arg0[%c2] : memref<4xf32, #tpu.memory_space<smem>>
    %c3 = arith.constant 3 : index
    %10 = memref.load %arg0[%c3] : memref<4xf32, #tpu.memory_space<smem>>
    %c0_2 = arith.constant 0 : index
    %11 = memref.load %arg0[%c0_2] : memref<4xf32, #tpu.memory_space<smem>>
    %12 = arith.mulf %11, %9 : f32
    %cst_3 = arith.constant 1.000000e+00 : f32
    %13 = arith.subf %cst_3, %9 : f32
    %14 = arith.mulf %4, %13 : f32
    %15 = arith.addf %12, %14 : f32
    %cst_4 = arith.constant 1.000000e+00 : f32
    %16 = arith.subf %cst_4, %10 : f32
    %17 = arith.divf %15, %16 : f32
    %c1 = arith.constant 1 : index
    %18 = memref.load %arg0[%c1] : memref<4xf32, #tpu.memory_space<smem>>
    %19 = arith.mulf %18, %9 : f32
    %cst_5 = arith.constant 1.000000e+00 : f32
    %20 = arith.subf %cst_5, %9 : f32
    %21 = arith.mulf %8, %20 : f32
    %22 = arith.addf %19, %21 : f32
    %cst_6 = arith.constant 1.000000e+00 : f32
    %23 = arith.subf %cst_6, %10 : f32
    %24 = arith.divf %22, %23 : f32
    %25 = vector.broadcast %17 : f32 to vector<8x128xf32>
    %c0_7 = arith.constant 0 : index
    %c0_8 = arith.constant 0 : index
    %26 = vector.load %arg3[%c0_7, %c0_8] : memref<8x128xf32, #tpu.memory_space<vmem>>, vector<8x128xf32>
    tpu.vector_store %arg3[%c0_7, %c0_8], %25 {strides = array<i32>} : memref<8x128xf32, #tpu.memory_space<vmem>>, vector<8x128xf32>,
    %27 = vector.broadcast %24 : f32 to vector<8x128xf32>
    %c0_9 = arith.constant 0 : index
    %c0_10 = arith.constant 0 : index
    %28 = vector.load %arg4[%c0_9, %c0_10] : memref<8x128xf32, #tpu.memory_space<vmem>>, vector<8x128xf32>
    tpu.vector_store %arg4[%c0_9, %c0_10], %27 {strides = array<i32>} : memref<8x128xf32, #tpu.memory_space<vmem>>, vector<8x128xf32>,
    %29 = arith.subf %24, %17 : f32
    %cst_11 = arith.constant 9.99999993E-9 : f32
    %30 = arith.maximumf %29, %cst_11 : f32
    %cst_12 = arith.constant 2.550000e+02 : f32
    %31 = arith.divf %cst_12, %30 : f32
    %32 = arith.mulf %31, %17 : f32
    %33 = math.roundeven %32 : f32
    %cst_13 = arith.constant 1.280000e+02 : f32
    %34 = arith.addf %33, %cst_13 : f32
    %cst_14 = arith.constant 1.000000e+00 : f32
    %35 = arith.divf %cst_14, %31 : f32
    %36 = vector.broadcast %31 : f32 to vector<16x128xf32>
    %37 = arith.mulf %36, %0 : vector<16x128xf32>
    %38 = vector.broadcast %34 : f32 to vector<16x128xf32>
    %39 = arith.subf %37, %38 : vector<16x128xf32>
    %40 = math.roundeven %39 : vector<16x128xf32>
    %cst_15 = arith.constant -1.280000e+02 : f32
    %cst_16 = arith.constant 1.270000e+02 : f32
    %41 = vector.broadcast %cst_15 : f32 to vector<16x128xf32>
    %42 = arith.maximumf %41, %40 : vector<16x128xf32>
    %43 = vector.broadcast %cst_16 : f32 to vector<16x128xf32>
    %44 = arith.minimumf %43, %42 : vector<16x128xf32>
    %45 = vector.broadcast %34 : f32 to vector<16x128xf32>
    %46 = arith.addf %44, %45 : vector<16x128xf32>
    %47 = vector.broadcast %35 : f32 to vector<16x128xf32>
    %48 = arith.mulf %46, %47 : vector<16x128xf32>
    %c0_17 = arith.constant 0 : index
    %c0_18 = arith.constant 0 : index
    %49 = vector.load %arg2[%c0_17, %c0_18] : memref<16x128xf32, #tpu.memory_space<vmem>>, vector<16x128xf32>
    tpu.vector_store %arg2[%c0_17, %c0_18], %48 {strides = array<i32>} : memref<16x128xf32, #tpu.memory_space<vmem>>, vector<16x128xf32>,
    return
  }
}

</mosaic_0001>

<bundles_post_ra>
// kernel: tpu_custom_call.1
= control target key start
LH: loop header
LB: loop body
LE: loop exit
PB: predicated region body
PF: predicated region fallthrough
CT: control target
= control target key end

     0   :  { %10 = vsyncpa [#allocation5], 0  ;;  %s378_s0 = inlined_call_operand.hbm [shape: f32[4], index: 0, kind: input, shape index: {}]   ;;  %s379_s1 = inlined_call_operand.hbm [shape: f32[16,128], index: 1, kind: input, shape index: {}]   ;;  %s380_s2 = inlined_call_operand.hbm [shape: f32[16,128], index: 2, kind: output, shape index: {0}]   ;;  %s381_s3 = inlined_call_operand.hbm [shape: f32[8,128], index: 3, kind: output, shape index: {1}]   ;;  %s382_s4 = inlined_call_operand.hbm [shape: f32[8,128], index: 4, kind: output, shape index: {2}]  }
   0x1   :  { %11 = vsyncpa [#allocation3], 0 }
   0x2   :  { %12 = vsyncpa [#allocation4], 0 }
   0x3   :  { %13 = vsyncpa [#allocation9], 0  ;;  %s309_s15 = smov [#allocation2]   ;;  %s310_s18 = smov [#allocation6]  }
   0x4   :  { %21 = dma.hbm_to_smem %s378_s0, 16, %s309_s15, [#allocation5]  }
   0x5   :  { %s27_s19 = sshll.u32 %s310_s18, 4  ;;  %s28_s19 = int_to_ptr.vmem [resolvable:$true] %s27_s19 }
   0x6   :  { %s229_s20 = scalar_lea.vmem %s28_s19, 256  ;;  %p234_p1 = scmp.lt.s32.totalorder %s28_s19, %s28_s19 }
   0x7   :  { %p230_p0 = scmp.ne.s32.totalorder %s28_s19, %s229_s20  ;;  %p235_p2 = scmp.lt.s32.totalorder %s229_s20, %s229_s20 }
   0x9   :  { %p236_p3 = por %p235_p2, %p234_p1 }
   0xb   :  { %p237_p4 = pnand %p236_p3, %p230_p0 }
   0xd   :  { %240 = shalt.err (!%p237_p4)
}
   0xe   :  { %s311_s21 = smov 128   ;;  %s312_s22 = smov 8  }
   0xf   :  { %33 = dma.hbm_to_vmem [thread:$0]  %s379_s1, 256, %s28_s19, [#allocation3], %s311_s21, %s311_s21, %s312_s22  }
  0x10   :  { %301 = dma.done.wait [#allocation5], 16  }
  0x11   :  { %302 = vsyncadd [#allocation5], 4294967280 }
  0x12   :  { %303 = dma.done.wait [#allocation3], 256  }
  0x13   :  { %304 = vsyncadd [#allocation3], 4294967040 }
  0x14   :  { %40 = sfence }
  0x15   :  { %v351_v0 = vld [vmem:[#allocation6] sm:$0xff]  ;;  %v353_v1 = vld [vmem:[#allocation6 + $0x8] sm:$0xff]  ;;  %s171_s0 = sld [smem:[#allocation2 + $0x3]]  ;;  %s313_s15 = smov 1e-08  }
  0x16   :  { %v43_v2 = vmin.f32 %v351_v0, %v353_v1  ;;  %v53_v3 = vmax.f32 %v351_v0, %v353_v1  ;;  %s170_s1 = sld [smem:[#allocation2 + $0x2]]  ;;  %s314_s17 = smov [#allocation8]  }
  0x17   :  { %s65_s26 = sld [smem:[#allocation2]]  ;;  %s143_s18 = sshll.u32 %s314_s17, 4  ;;  %s144_s18 = int_to_ptr.vmem [resolvable:$true] %s143_s18 }
  0x18   :  { %44 = vmin.xlane.f32.xlu0 %v43_v2  ;;  %s172_s27 = sld [smem:[#allocation2 + $0x1]]  ;;  %s241_s19 = scalar_lea.vmem %s144_s18, 128 }
  0x19   :  { %p242_p5 = scmp.ne.s32.totalorder %s144_s18, %s241_s19  ;;  %p246_p6 = scmp.lt.s32.totalorder %s144_s18, %s144_s18 }
  0x1a   :  { %p247_p7 = scmp.lt.s32.totalorder %s241_s19, %s241_s19 }
  0x1b   :  { %s70_s25 = ssub.f32 1.0, %s171_s0 }
  0x1c   :  { %54 = vmax.xlane.f32.xlu0 %v53_v3  ;;  %s67_s28 = ssub.f32 1.0, %s170_s1  ;;  %p248_p8 = por %p247_p7, %p246_p6 }
  0x1d   :  { %v71_v4 = vstv %s70_s25  ;;  %s66_s29 = smul.f32 %s170_s1, %s65_s26 }
  0x1e   :  { %207 = vrcp.f32 %v71_v4  ;;  %s76_s7 = smul.f32 %s172_s27, %s170_s1  ;;  %p249_p9 = pnand %p248_p8, %p242_p5 }
  0x2b   :  { %v208_v18 = vpop.eup %207 }
  0xa1   :  { %v45_v5 = vpop.xlane.xlu0 %44 }
  0xa2   :  { %v46_v6 = vrot.slane %v45_v5, 4 }
  0xa4   :  { %v47_v7 = vmin.f32 %v45_v5, %v46_v6 }
  0xa5   :  { %v55_v8 = vpop.xlane.xlu0 %54 }
  0xa6   :  { %v48_v9 = vrot.slane %v47_v7, 2  ;;  %v56_v10 = vrot.slane %v55_v8, 4 }
  0xa8   :  { %v57_v11 = vmax.f32 %v55_v8, %v56_v10  ;;  %v49_v12 = vmin.f32 %v47_v7, %v48_v9 }
  0xaa   :  { %v58_v13 = vrot.slane %v57_v11, 2  ;;  %v50_v14 = vrot.slane %v49_v12, 1 }
  0xac   :  { %v59_v15 = vmax.f32 %v57_v11, %v58_v13  ;;  %v51_v16 = vmin.f32 %v49_v12, %v50_v14 }
  0xae   :  { %173 = vpush %v51_v16  ;;  %v60_v17 = vrot.slane %v59_v15, 1 }
  0xb0   :  { %v61_v19 = vmax.f32 %v59_v15, %v60_v17 }
  0xb2   :  { %175 = vpush %v61_v19 }
  0xb3   :  { %177 = vpush %v208_v18 }
  0xdf   :  { %s174_s30 = spop %173 }
  0xe0   :  { %s68_s5 = smul.f32 %s174_s30, %s67_s28 }
  0xe2   :  { %s69_s6 = sadd.f32 %s68_s5, %s66_s29 }
  0xe3   :  { %s176_s8 = spop %175 }
  0xe4   :  { %s77_s9 = smul.f32 %s176_s8, %s67_s28  ;;  %s178_s10 = spop %177 }
  0xe5   :  { %s359_s11 = smul.f32 %s178_s10, %s69_s6 }
  0xe6   :  { %s78_s12 = sadd.f32 %s77_s9, %s76_s7 }
  0xe7   :  { %v83_v20 = vstv %s359_s11 }
  0xe8   :  { %s82_s13 = smul.f32 %s178_s10, %s78_s12  ;;  %84 = vst [vmem:[#allocation8] sm:$0xff] %v83_v20 }
  0xea   :  { %s87_s14 = ssub.f32 %s82_s13, %s359_s11  ;;  %v85_v21 = vstv %s82_s13 }
  0xeb   :  { %86 = vst [vmem:[#allocation10] sm:$0xff] %v85_v21 }
  0xec   :  { %s88_s16 = smax.f32 %s313_s15, %s87_s14 }
  0xed   :  { %v89_v22 = vstv %s88_s16 }
  0xee   :  { %209 = vrcp.f32 %v89_v22 }
  0xef   :  { %252 = shalt.err (!%p249_p9)
}
  0xf0   :  { %146 = dma.vmem_to_hbm [thread:$0]  %s144_s18, 128, %s381_s3, [#allocation9]  }
  0xf1   :  { %s315_s24 = smov [#allocation10]  }
  0xf2   :  { %s153_s0 = sshll.u32 %s315_s24, 4  ;;  %s154_s0 = int_to_ptr.vmem [resolvable:$true] %s153_s0 }
  0xf3   :  { %s261_s25 = scalar_lea.vmem %s154_s0, 128  ;;  %p266_p11 = scmp.lt.s32.totalorder %s154_s0, %s154_s0 }
  0xf4   :  { %p262_p10 = scmp.ne.s32.totalorder %s154_s0, %s261_s25  ;;  %p267_p12 = scmp.lt.s32.totalorder %s261_s25, %s261_s25 }
  0xf6   :  { %p268_p13 = por %p267_p12, %p266_p11 }
  0xf8   :  { %p269_p0 = pnand %p268_p13, %p262_p10 }
  0xfa   :  { %272 = shalt.err (!%p269_p0)
}
  0xfb   :  { %156 = dma.vmem_to_hbm [thread:$0]  %s154_s0, 128, %s382_s4, [#allocation9]   ;;  %v210_v23 = vpop.eup %209 }
  0xfc   :  { %179 = vpush %v210_v23  ;;  %s316_s4 = smov [#allocation7]  }
  0xfd   :  { %s130_s10 = sshll.u32 %s316_s4, 4  ;;  %s131_s10 = int_to_ptr.vmem [resolvable:$true] %s130_s10 }
  0xfe   :  { %s281_s12 = scalar_lea.vmem %s131_s10, 256  ;;  %p286_p3 = scmp.lt.s32.totalorder %s131_s10, %s131_s10 }
  0xff   :  { %p282_p2 = scmp.ne.s32.totalorder %s131_s10, %s281_s12  ;;  %p287_p4 = scmp.lt.s32.totalorder %s281_s12, %s281_s12 }
 0x101   :  { %p288_p5 = por %p287_p4, %p286_p3 }
 0x103   :  { %p289_p6 = pnand %p288_p5, %p282_p2 }
 0x12d   :  { %s180_s27 = spop %179 }
 0x12e   :  { %s92_s28 = smul.f32 255.0, %s180_s27 }
 0x130   :  { %v103_v24 = vstv %s92_s28  ;;  %s93_s3 = smul.f32 %s92_s28, %s359_s11 }
 0x131   :  { %211 = vrcp.f32 %v103_v24  ;;  %v107_v27 = vmul.f32 %v103_v24, %v351_v0  ;;  %v108_v28 = vmul.f32 %v103_v24, %v353_v1 }
 0x132   :  { %s94_s29 = scvt.f32.s32 %s93_s3  ;;  %s99_s6 = sand.u32 2147483647, %s93_s3 }
 0x133   :  { %s97_s7 = sand.u32 2147483648, %s93_s3  ;;  %p100_p1 = scmp.lt.f32.partialorder %s99_s6, 2.1474836e+09 }
 0x134   :  { %s95_s30 = scvt.s32.f32 %s94_s29 }
 0x136   :  { %s96_s5 = sand.u32 2147483647, %s95_s30 }
 0x137   :  { %s98_s8 = sor.u32 %s97_s7, %s96_s5 }
 0x138   :  { %s384_s8 = smov (!%p100_p1, %s98_s8), %s93_s3 }
 0x139   :  { %s102_s9 = sadd.f32 128.0, %s384_s8 }
 0x13b   :  { %v109_v26 = vstv %s102_s9 }
 0x13c   :  { %v110_v29 = vsub.f32 %v107_v27, %v109_v26  ;;  %v111_v30 = vsub.f32 %v108_v28, %v109_v26 }
 0x13e   :  { %v212_v25 = vpop.eup %211  ;;  %v185_v31 = vcvt.f32.s32 %v110_v29  ;;  %v193_v32 = vcvt.f32.s32 %v111_v30  ;;  %v188_v37 = vand.u32 2147483648, %v110_v29  ;;  %v196_v38 = vand.u32 2147483648, %v111_v30 }
 0x13f   :  { %181 = vpush %v212_v25  ;;  %v183_v39 = vand.u32 2147483647, %v110_v29  ;;  %v191_v40 = vand.u32 2147483647, %v111_v30 }
 0x140   :  { %v186_v33 = vcvt.s32.f32 %v185_v31  ;;  %v194_v34 = vcvt.s32.f32 %v193_v32 }
 0x141   :  { %vm184_vm0 = vcmp.lt.f32.partialorder %v183_v39, 8388608.0  ;;  %vm192_vm1 = vcmp.lt.f32.partialorder %v191_v40, 8388608.0 }
 0x142   :  { %v187_v35 = vand.u32 2147483647, %v186_v33  ;;  %v195_v36 = vand.u32 2147483647, %v194_v34 }
 0x144   :  { %v189_v41 = vor.u32 %v188_v37, %v187_v35  ;;  %v197_v42 = vor.u32 %v196_v38, %v195_v36 }
 0x146   :  { %v190_v43 = vsel %vm184_vm0, %v189_v41, %v110_v29  ;;  %v198_v44 = vsel %vm192_vm1, %v197_v42, %v111_v30 }
 0x147   :  { %v114_v45 = vmax.f32 %v190_v43, -128.0  ;;  %v115_v46 = vmax.f32 %v198_v44, -128.0 }
 0x149   :  { %v116_v47 = vmin.f32 %v114_v45, 127.0  ;;  %v117_v48 = vmin.f32 %v115_v46, 127.0 }
 0x14b   :  { %v118_v49 = vadd.f32 %v116_v47, %v109_v26  ;;  %v119_v50 = vadd.f32 %v117_v48, %v109_v26 }
 0x170   :  { %s182_s11 = spop %181 }
 0x171   :  { %v120_v51 = vstv %s182_s11 }
 0x172   :  { %v121_v52 = vmul.f32 %v120_v51, %v118_v49  ;;  %v122_v53 = vmul.f32 %v120_v51, %v119_v50 }
 0x174   :  { %123 = vst [vmem:[#allocation7] sm:$0xff] %v121_v52  ;;  %124 = vst [vmem:[#allocation7 + $0x8] sm:$0xff] %v122_v53 }
 0x175   :  { %292 = shalt.err (!%p289_p6)
}
 0x176   :  { %136 = dma.vmem_to_hbm [thread:$0]  %s131_s10, 256, %s380_s2, [#allocation4], %s311_s21, %s311_s21, %s312_s22  }
 0x177   :  { %305 = dma.done.wait [#allocation4], 256  }
 0x178   :  { %306 = vsyncadd [#allocation4], 4294967040 }
 0x179   :  { %307 = dma.done.wait [#allocation9], 256  }
 0x17a   :  { %308 = vsyncadd [#allocation9], 4294967040 }
 0x17b   :  { %166 = vsyncpa [#allocation3], 1 }
 0x17c   :  { %167 = vsyncpa [#allocation4], 1 }
 0x17d   :  { %168 = vsyncpa [#allocation9], 1 }
 0x17e   :  { %169 = vsyncpa [#allocation5], 1 }

</bundles_post_ra>
